<compile_context>
chip_gen: v6e
topology: v6e:2x2x1
jax: 0.10.0
libtpu: 0.0.40
codegen_flags: <defaults>
</compile_context>

<pallas_src>
import numpy as np
import jax
import jax.numpy as jnp
from jax import lax
from jax.experimental import pallas as pl
from jax.experimental.pallas import tpu as pltpu


# ------------------------------ Pallas kernel ------------------------------ #

def _se_kernel(x_ref, w1t_ref, w2_ref, o_ref):
    """Fused SE block for a batch-block of Nb images.

    x_ref  : (Nb, C, HW)  activations, channels on sublanes, spatial on lanes
    w1t_ref: (C, Cr)      fc1 weight, pre-transposed to (cin, cmid), f32
    w2_ref : (C, Cr)      fc2 weight (cout, cmid), f32
    o_ref  : (Nb, C, HW)  output = x * gate
    """
    # Global average pool over the spatial (lane) axis, accumulated in f32
    # regardless of the activation dtype (bf16 mean over many elements drifts).
    pooled = jnp.mean(x_ref[...], axis=2, keepdims=True,
                      dtype=jnp.float32)                          # (Nb, C, 1)

    # fc1 (1x1 conv, C -> Cr) + ReLU as broadcast-multiply + sublane reduce.
    # Kept off the MXU on purpose: a 1-row matvec would waste a full systolic
    # fill and the kernel is HBM-bound anyway.
    h = jnp.sum(pooled * w1t_ref[...][None, :, :], axis=1)        # (Nb, Cr)
    h = jnp.maximum(h, 0.0)

    # fc2 (1x1 conv, Cr -> C) as broadcast-multiply + lane reduce.
    g = jnp.sum(w2_ref[...][None, :, :] * h[:, None, :],
                axis=2, keepdims=True)                            # (Nb, C, 1)

    # Sigmoid gate in f32 (EUP exp + reciprocal), cast to the activation dtype,
    # then scale.  Re-read x from VMEM here instead of keeping the tile live
    # across the gate math (cheap reloads, no register spills on big blocks).
    g = jax.nn.sigmoid(g).astype(o_ref.dtype)
    o_ref[...] = x_ref[...] * g


# ------------------------------ block sizing ------------------------------- #

def _pick_batch_block(n, per_image_bytes, target_block_bytes, min_grid_steps):
    """Images per grid step: ~target_block_bytes per block, but keep at least
    `min_grid_steps` grid steps when N allows, and divide N evenly."""
    nb_by_bytes = max(1, target_block_bytes // max(per_image_bytes, 1))
    nb_by_steps = max(1, n // min_grid_steps)
    nb = max(1, min(n, nb_by_bytes, nb_by_steps))
    while n % nb:           # shrink to a divisor of N (no ragged last block)
        nb -= 1
    return nb


# --------------------------------- wrapper ---------------------------------- #

def se_module_forward(x_nchw, w_fc1, w_fc2, *,
                      target_block_bytes=2 << 20, min_grid_steps=8):
    """SEModule forward.  x_nchw: (N, C, H, W) like PyTorch.

    w_fc1: (C//r, C, 1, 1)  fc1 1x1-conv weight (no bias)
    w_fc2: (C, C//r, 1, 1)  fc2 1x1-conv weight (no bias)
    """
    N, C, H, W = x_nchw.shape
    Cr = w_fc1.shape[0]
    HW = H * W

    # NCHW -> (N, C, H*W): contiguous view, no data movement; puts the spatial
    # axis on TPU lanes (lane-dense loads/stores; HW=256 is a multiple of 128).
    x2 = x_nchw.reshape(N, C, HW)
    w1t = jnp.transpose(w_fc1.reshape(Cr, C), (1, 0)).astype(jnp.float32)  # (C, Cr)
    w2 = w_fc2.reshape(C, Cr).astype(jnp.float32)                          # (C, Cr)

    itemsize = x2.dtype.itemsize
    per_image_bytes = C * HW * itemsize
    nb = _pick_batch_block(N, per_image_bytes, target_block_bytes, min_grid_steps)
    grid = N // nb

    # VMEM budget: double-buffered input + output blocks, the (tiny) weights,
    # plus headroom.  Clamp below v7x's 64 MiB/TC so it is valid everywhere.
    block_bytes = nb * per_image_bytes
    vmem_need = 4 * block_bytes + 4 * (w1t.size + w2.size) * 4 + (1 << 20)
    vmem_limit = int(min(max(vmem_need, 32 << 20), 60 << 20))

    out = pl.pallas_call(
        _se_kernel,
        out_shape=jax.ShapeDtypeStruct((N, C, HW), x2.dtype),
        grid_spec=pltpu.PrefetchScalarGridSpec(
            num_scalar_prefetch=0,
            grid=(grid,),
            in_specs=[
                pl.BlockSpec((nb, C, HW), lambda i: (i, 0, 0)),
                pl.BlockSpec((C, Cr), lambda i: (0, 0)),
                pl.BlockSpec((C, Cr), lambda i: (0, 0)),
            ],
            out_specs=pl.BlockSpec((nb, C, HW), lambda i: (i, 0, 0)),
        ),
        compiler_params=pltpu.CompilerParams(
            dimension_semantics=("parallel",),   # batch blocks across TCs (v7x)
            vmem_limit_bytes=vmem_limit,
        ),
    )(x2, w1t, w2)
    return out.reshape(N, C, H, W)


# ---------------------------- pure-JAX reference ---------------------------- #

def reference_forward(x, w_fc1, w_fc2):
    dn = ("NCHW", "OIHW", "NCHW")
    pooled = jnp.mean(x, axis=(2, 3), keepdims=True)
    s = lax.conv_general_dilated(pooled, w_fc1, (1, 1), "VALID",
                                 dimension_numbers=dn)
    s = jnp.maximum(s, 0.0)
    s = lax.conv_general_dilated(s, w_fc2, (1, 1), "VALID",
                                 dimension_numbers=dn)
    s = jax.nn.sigmoid(s)
    return x * s


# ----------------------------------- main ----------------------------------- #

if __name__ == "__main__":
    key = jax.random.PRNGKey(0)
    N, C, H, W, reduction = 2, 32, 16, 16, 8
    Cr = C // reduction

    kx, k1, k2 = jax.random.split(key, 3)
    x = jax.random.normal(kx, (N, C, H, W), jnp.float32)
    w_fc1 = jax.random.normal(k1, (Cr, C, 1, 1), jnp.float32) * 0.2
    w_fc2 = jax.random.normal(k2, (C, Cr, 1, 1), jnp.float32) * 0.2

    out = se_module_forward(x, w_fc1, w_fc2)
    out = jax.block_until_ready(out)

    ref = jax.block_until_ready(reference_forward(x, w_fc1, w_fc2))

    assert out.shape == (N, C, H, W), out.shape
    np.testing.assert_allclose(np.asarray(out), np.asarray(ref),
                               atol=1e-4, rtol=1e-4)
    print("KERNEL_OK")
</pallas_src>

<mosaic_0001>
module attributes {stable_mosaic.version = 11 : i64} {
  func.func @_se_kernel(%arg0: i32, %arg1: memref<1x32x256xf32, #tpu.memory_space<vmem>>, %arg2: memref<32x4xf32, #tpu.memory_space<vmem>>, %arg3: memref<32x4xf32, #tpu.memory_space<vmem>>, %arg4: memref<1x32x256xf32, #tpu.memory_space<vmem>>) attributes {dimension_semantics = [#tpu.dimension_semantics<parallel>], iteration_bounds = array<i64: 2>, scalar_prefetch = 0 : i64, scratch_operands = 0 : i64, tpu.core_type = #tpu.core_type<tc>, window_params = [{transform_indices = @transform_0, window_bounds = array<i64: 1, 32, 256>}, {pipeline_mode = #tpu.pipeline_mode<synchronous>, transform_indices = @transform_1, window_bounds = array<i64: 32, 4>}, {pipeline_mode = #tpu.pipeline_mode<synchronous>, transform_indices = @transform_2, window_bounds = array<i64: 32, 4>}, {transform_indices = @transform_3, window_bounds = array<i64: 1, 32, 256>}]} {
    %c0 = arith.constant 0 : index
    %c0_0 = arith.constant 0 : index
    %c0_1 = arith.constant 0 : index
    %0 = vector.load %arg1[%c0, %c0_0, %c0_1] : memref<1x32x256xf32, #tpu.memory_space<vmem>>, vector<1x32x256xf32>
    %cst = arith.constant dense<0.000000e+00> : vector<1x32xf32>
    %1 = vector.multi_reduction <add>, %0, %cst [2] : vector<1x32x256xf32> to vector<1x32xf32>
    %2 = vector.shape_cast %1 : vector<1x32xf32> to vector<1x32x1xf32>
    %cst_2 = arith.constant 2.560000e+02 : f32
    %3 = vector.broadcast %cst_2 : f32 to vector<1x32x1xf32>
    %4 = arith.divf %2, %3 : vector<1x32x1xf32>
    %c0_3 = arith.constant 0 : index
    %c0_4 = arith.constant 0 : index
    %5 = vector.load %arg2[%c0_3, %c0_4] : memref<32x4xf32, #tpu.memory_space<vmem>>, vector<32x4xf32>
    %6 = vector.shape_cast %5 : vector<32x4xf32> to vector<1x32x4xf32>
    %7 = vector.broadcast %4 : vector<1x32x1xf32> to vector<1x32x4xf32>
    %8 = arith.mulf %7, %6 : vector<1x32x4xf32>
    %cst_5 = arith.constant dense<0.000000e+00> : vector<1x4xf32>
    %9 = vector.multi_reduction <add>, %8, %cst_5 [1] : vector<1x32x4xf32> to vector<1x4xf32>
    %cst_6 = arith.constant 0.000000e+00 : f32
    %10 = vector.broadcast %cst_6 : f32 to vector<1x4xf32>
    %11 = arith.maximumf %9, %10 : vector<1x4xf32>
    %c0_7 = arith.constant 0 : index
    %c0_8 = arith.constant 0 : index
    %12 = vector.load %arg3[%c0_7, %c0_8] : memref<32x4xf32, #tpu.memory_space<vmem>>, vector<32x4xf32>
    %13 = vector.shape_cast %12 : vector<32x4xf32> to vector<1x32x4xf32>
    %14 = vector.shape_cast %11 : vector<1x4xf32> to vector<1x1x4xf32>
    %15 = vector.broadcast %14 : vector<1x1x4xf32> to vector<1x32x4xf32>
    %16 = arith.mulf %13, %15 : vector<1x32x4xf32>
    %cst_9 = arith.constant dense<0.000000e+00> : vector<1x32xf32>
    %17 = vector.multi_reduction <add>, %16, %cst_9 [2] : vector<1x32x4xf32> to vector<1x32xf32>
    %18 = vector.shape_cast %17 : vector<1x32xf32> to vector<1x32x1xf32>
    %19 = arith.negf %18 : vector<1x32x1xf32>
    %20 = math.exp %19 : vector<1x32x1xf32>
    %cst_10 = arith.constant 1.000000e+00 : f32
    %21 = vector.broadcast %cst_10 : f32 to vector<1x32x1xf32>
    %22 = arith.addf %21, %20 : vector<1x32x1xf32>
    %23 = arith.divf %21, %22 : vector<1x32x1xf32>
    %c0_11 = arith.constant 0 : index
    %c0_12 = arith.constant 0 : index
    %c0_13 = arith.constant 0 : index
    %24 = vector.load %arg1[%c0_11, %c0_12, %c0_13] : memref<1x32x256xf32, #tpu.memory_space<vmem>>, vector<1x32x256xf32>
    %25 = vector.broadcast %23 : vector<1x32x1xf32> to vector<1x32x256xf32>
    %26 = arith.mulf %24, %25 : vector<1x32x256xf32>
    %c0_14 = arith.constant 0 : index
    %c0_15 = arith.constant 0 : index
    %c0_16 = arith.constant 0 : index
    %27 = vector.load %arg4[%c0_14, %c0_15, %c0_16] : memref<1x32x256xf32, #tpu.memory_space<vmem>>, vector<1x32x256xf32>
    tpu.vector_store %arg4[%c0_14, %c0_15, %c0_16], %26 {strides = array<i32>} : memref<1x32x256xf32, #tpu.memory_space<vmem>>, vector<1x32x256xf32>,
    return
  }
  func.func @transform_0(%arg0: i32) -> (i32, i32, i32) {
    %c0_i32 = arith.constant 0 : i32
    %c0_i32_0 = arith.constant 0 : i32
    %c0_i32_1 = arith.constant 0 : i32
    return %arg0, %c0_i32, %c0_i32_0 : i32, i32, i32
  }
  func.func @transform_1(%arg0: i32) -> (i32, i32) {
    %c0_i32 = arith.constant 0 : i32
    %c0_i32_0 = arith.constant 0 : i32
    %c0_i32_1 = arith.constant 0 : i32
    return %c0_i32, %c0_i32_0 : i32, i32
  }
  func.func @transform_2(%arg0: i32) -> (i32, i32) {
    %c0_i32 = arith.constant 0 : i32
    %c0_i32_0 = arith.constant 0 : i32
    %c0_i32_1 = arith.constant 0 : i32
    return %c0_i32, %c0_i32_0 : i32, i32
  }
  func.func @transform_3(%arg0: i32) -> (i32, i32, i32) {
    %c0_i32 = arith.constant 0 : i32
    %c0_i32_0 = arith.constant 0 : i32
    %c0_i32_1 = arith.constant 0 : i32
    return %arg0, %c0_i32, %c0_i32_0 : i32, i32, i32
  }
}

</mosaic_0001>

<bundles_post_ra>
// kernel: tpu_custom_call.1
= control target key start
LH: loop header
LB: loop body
LE: loop exit
PB: predicated region body
PF: predicated region fallthrough
CT: control target
= control target key end

     0   :  { %8 = vsyncpa [#allocation3], 0  ;;  %s812_s0 = inlined_call_operand.hbm [shape: f32[2,32,256], index: 0, kind: input, shape index: {}]   ;;  %s813_s1 = inlined_call_operand.vmem [shape: f32[32,4], index: 1, kind: input, shape index: {}]   ;;  %s814_s2 = inlined_call_operand.vmem [shape: f32[32,4], index: 2, kind: input, shape index: {}]   ;;  %s815_s3 = inlined_call_operand.hbm [shape: f32[2,32,256], index: 3, kind: output, shape index: {}]  }
   0x1   :  { %10 = vsyncpa [#allocation3 + $0x1], 0 }
   0x2   :  { %11 = vsyncpa [#allocation4], 0 }
   0x3   :  { %13 = vsyncpa [#allocation4 + $0x1], 0  ;;  %s590_s12 = smov 0   ;;  %s592_s13 = smov 0  }
   0x4   :  { %s594_s14 = smov 0   ;;  %s596_s15 = smov 0  }
   0x5 LB: > { %s611_s16 = sadd.s32 4294967295, %s562_s15   ;;  %s384_s17 = sadd.s32 4294967294, %s562_s15   ;;  %s562_s15 = sphi %s596_s15, %s830_s15   ;;  %s558_s14 = sphi %s594_s14, %s829_s14   ;;  %s554_s13 = sphi %s592_s13, %s828_s13   ;;  %s550_s12 = sphi %s590_s12, %s827_s12  }
   0x6   : > { %s615_s18 = sadd.s32 1, %s562_s15   ;;  %s26_s19 = sadd.s32 1, %s558_s14 }
   0x7   : > { %s23_s20 = ssub.s32 %s562_s15, %s615_s18  ;;  %p33_p0 = scmp.ne.s32.totalorder %s558_s14, %s554_s13 }
   0x8   : > { %p24_p1 = scmp.eq.s32.totalorder %s23_s20, 0  ;;  %p34_p2 = scmp.eq.s32.totalorder %s562_s15, 0 }
   0x9   : > { %p39_p3 = scmp.ne.s32.totalorder %s554_s13, %s550_s12  ;;  %p40_p4 = scmp.eq.s32.totalorder %s611_s16, 0 }
   0xa   : > { %s627_s21 = scalar_select %p24_p1, %s558_s14, %s26_s19  }
   0xb   : > { %p629_p5 = por %p34_p2, %p33_p0  ;;  %p633_p6 = por %p40_p4, %p39_p3 }
   0xc   : > { %p105_p7 = scmp.eq.s32.totalorder %s611_s16, 1  ;;  %p111_p8 = scmp.eq.s32.totalorder %s384_s17, 1 }
   0xd   : > { %s819_s23 = scalar_select %p633_p6, 1, 0 }
   0xe   : > { %p416_p10 = scmp.lt.s32.totalorder %s562_s15, 2  ;;  %p640_p11 = por %p105_p7, %p33_p0 }
   0xf   : > { %p644_p12 = por %p111_p8, %p39_p3  ;;  %s137_s26 = sand.u32 1, %s558_s14  }
  0x10   : > { %s820_s24 = scalar_select %p640_p11, 1, 0 }
  0x11   : > { %s821_s25 = scalar_select %p644_p12, 1, 0 }
  0x12   : > { %s402_s27 = sshll.u32 %s562_s15, 10  ;;  %s387_s28 = sshll.u32 %s137_s26, 6 }
  0x13   : > { %s653_s4 = scalar_lea.hbm %s812_s0, %s402_s27  ;;  %s141_s5 = scalar_lea.vmem [#allocation2], %s387_s28 }
  0x14   : > { %s148_s6 = sshll.u32 %s141_s5, 4  ;;  %p657_p13 = pnand %p416_p10, %p629_p5  ;;  %s661_s6 = int_to_ptr.vmem [resolvable:$true] %s148_s6 }
  0x15   : > { %s663_s8 = scalar_lea.sflag [#allocation3], %s137_s26  ;;  %s470_s9 = scalar_lea.hbm %s653_s4, 1024 }
  0x16   : > { %p471_p0 = scmp.ne.s32.totalorder %s653_s4, %s470_s9  ;;  %p472_p1 = pneg %p657_p13 }
  0x17   : > { %s475_s17 = scalar_lea.hbm %s812_s0, 2048  ;;  %p476_p4 = scmp.lt.s32.totalorder %s653_s4, %s812_s0 }
  0x18   : > { %p473_p2 = pnand %p472_p1, %p471_p0  ;;  %p477_p5 = scmp.lt.s32.totalorder %s475_s17, %s470_s9 }
  0x1a   : > { %p474_p3 = pneg %p473_p2  ;;  %p478_p7 = por %p477_p5, %p476_p4 }
  0x1c   : > { %p479_p8 = pnand %p478_p7, %p474_p3 }
  0x1e   : > { %482 = shalt.err (!%p479_p8)
}
  0x1f   : > { %s483_s22 = scalar_lea.vmem %s661_s6, 1024  ;;  %s564_s26 = smov [#allocation2]  }
  0x20   : > { %p484_p10 = scmp.ne.s32.totalorder %s661_s6, %s483_s22  ;;  %s488_s27 = sshll.u32 %s564_s26, 4  ;;  %s489_s27 = int_to_ptr.vmem [resolvable:$false] %s488_s27 }
  0x21   : > { %s490_s28 = scalar_lea.vmem %s489_s27, 2048  ;;  %p491_p2 = scmp.lt.s32.totalorder %s661_s6, %s489_s27 }
  0x22   : > { %p486_p9 = pnand %p484_p10, %p472_p1  ;;  %p492_p12 = scmp.lt.s32.totalorder %s490_s28, %s483_s22 }
  0x24   : > { %p487_p0 = pneg %p486_p9  ;;  %p493_p11 = por %p492_p12, %p491_p2 }
  0x26   : > { %p494_p6 = pnand %p493_p11, %p487_p0 }
  0x28   : > { %497 = shalt.err (!%p494_p6)
}
  0x29   : > { %s565_s29 = smov 256   ;;  %s566_s30 = smov 16  }
  0x2a   : > { %411 = dma.hbm_to_vmem [thread:$0]  (!%p657_p13), %s653_s4, 1024, %s661_s6, %s663_s8, %s565_s29, %s565_s29, %s566_s30  }
  0x2b   : > { %p390_p9 = scmp.ge.s32.totalorder %s562_s15, 1  ;;  %p156_p1 = scmp.lt.s32.totalorder %s562_s15, 3 }
  0x2d   : > { %p157_p3 = pnand %p390_p9, %p156_p1 }
  0x2e   : > { %s687_s5 = sand.u32 (!%p157_p3), 1, %s554_s13   ;;  %p823_p6 = scmp.ne.s32.totalorder (!%p157_p3), %s819_s23, 0 }
  0x2f   : > { %160 = sbr.rel (%p157_p3) target bundleno = 417 (0x1a1), region = 32  ;;  %s391_s9 = sshll.u32 (!%p157_p3), %s687_s5, 6 }
  0x30   : > { %s163_s10 = scalar_lea.sflag (!%p157_p3), [#allocation3], %s687_s5  ;;  %s166_s11 = scalar_lea.vmem (!%p157_p3), [#allocation2], %s391_s9 }
  0x34   : > { %541 = dma.done.wait (%p823_p6), %s163_s10, 1024  }
  0x35   : > { %543 = vsyncadd (%p823_p6), %s163_s10, 4294966272  ;;  %v697_v0 = vld [vmem:[%s166_s11] sm:$0xff]  ;;  %v699_v1 = vld [vmem:[%s166_s11 + $0x8] sm:$0xff]  ;;  %vm222_vm0 = vcmask 31744   ;;  %s403_s23 = sshll.u32 %s611_s16, 10  ;;  %s188_s4 = scalar_lea.vmem [#allocation5], %s391_s9 }
  0x36   : > { %v701_v2 = vld [vmem:[%s166_s11 + $0x20] sm:$0xff]  ;;  %v197_v3 = vadd.f32 %v699_v1, %v697_v0  ;;  %v705_v4 = vld [vmem:[%s166_s11 + $0x28] sm:$0xff]  ;;  %v707_v5 = vld [vmem:[%s166_s11 + $0x10] sm:$0xff]  ;;  %s311_s6 = sshll.u32 %s188_s4, 4  ;;  %s765_s17 = scalar_lea.hbm %s815_s3, %s403_s23  ;;  %s767_s6 = int_to_ptr.vmem [resolvable:$true] %s311_s6 }
  0x37   : > { %v709_v6 = vld [vmem:[%s166_s11 + $0x18] sm:$0xff]  ;;  %v203_v7 = vadd.f32 %v705_v4, %v701_v2  ;;  %v713_v8 = vld [vmem:[%s166_s11 + $0x30] sm:$0xff]  ;;  %v214_v15 = vld [vmem:[%s813_s1] sm:$0xff]  ;;  %s298_s16 = scalar_lea.sflag [#allocation4], %s687_s5  ;;  %s498_s9 = scalar_lea.vmem %s767_s6, 1024 }
  0x38   : > { %v715_v9 = vld [vmem:[%s166_s11 + $0x38] sm:$0xff]  ;;  %198 = vadd.xlane.f32.xlu0 %v197_v3  ;;  %v200_v10 = vadd.f32 %v709_v6, %v707_v5  ;;  %v216_v17 = vld [vmem:[%s813_s1 + $0x10] sm:$0xff]  ;;  %v215_v18 = vld [vmem:[%s813_s1 + $0x8] sm:$0xff]  ;;  %p499_p11 = scmp.ne.s32.totalorder %s767_s6, %s498_s9  ;;  %p824_p12 = scmp.ne.s32.totalorder %s820_s24, 0 }
  0x39   : > { %204 = vadd.xlane.f32.xlu1 %v203_v7  ;;  %v206_v11 = vadd.f32 %v715_v9, %v713_v8  ;;  %v217_v22 = vld [vmem:[%s813_s1 + $0x18] sm:$0xff]  ;;  %v238_v41 = vld [vmem:[%s814_s2 + $0x8] sm:$0xff]  ;;  %v237_v42 = vld [vmem:[%s814_s2] sm:$0xff]  ;;  %s567_s19 = smov [#allocation5]  }
  0x3a   : > { %v240_v44 = vld [vmem:[%s814_s2 + $0x18] sm:$0xff]  ;;  %v239_v45 = vld [vmem:[%s814_s2 + $0x10] sm:$0xff]  ;;  %p500_p13 = pnand %p499_p11, %p824_p12  ;;  %s502_s20 = sshll.u32 %s567_s19, 4  ;;  %s503_s20 = int_to_ptr.vmem [resolvable:$false] %s502_s20 }
  0x3b   : > { %s504_s22 = scalar_lea.vmem %s503_s20, 2048  ;;  %p505_p5 = scmp.lt.s32.totalorder %s767_s6, %s503_s20 }
  0x3c   : > { %201 = vadd.xlane.f32.xlu0 %v200_v10  ;;  %p501_p4 = pneg %p500_p13  ;;  %p506_p7 = scmp.lt.s32.totalorder %s504_s22, %s498_s9 }
  0x3d   : > { %207 = vadd.xlane.f32.xlu1 %v206_v11 }
  0x3e   : > { %p507_p8 = por %p506_p7, %p505_p5 }
  0x40   : > { %p508_p10 = pnand %p507_p8, %p501_p4 }
  0xc1   : > { %v199_v12 = vpop.xlane.xlu0 %198 }
  0xc2   : > { %v210_v13 = vmul.f32 0.00390625, %v199_v12  ;;  %v205_v14 = vpop.xlane.xlu1 %204 }
  0xc3   : > { %v212_v16 = vmul.f32 0.00390625, %v205_v14 }
  0xc4   : > { %v218_v20 = vmul.f32 %v214_v15, %v210_v13 }
  0xc5   : > { %v202_v19 = vpop.xlane.xlu0 %201  ;;  %v220_v25 = vmul.f32 %v216_v17, %v212_v16 }
  0xc6   : > { %v211_v21 = vmul.f32 0.00390625, %v202_v19  ;;  %v208_v23 = vpop.xlane.xlu1 %207  ;;  %v223_v28 = vsel %vm222_vm0, %v218_v20, 0.0 }
  0xc7   : > { %v213_v24 = vmul.f32 0.00390625, %v208_v23  ;;  %v226_v31 = vsel %vm222_vm0, %v220_v25, 0.0 }
  0xc8   : > { %v219_v26 = vmul.f32 %v215_v18, %v211_v21 }
  0xc9   : > { %v221_v27 = vmul.f32 %v217_v22, %v213_v24 }
  0xca   : > { %v224_v29 = vsel %vm222_vm0, %v219_v26, 0.0 }
  0xcb   : > { %v225_v30 = vadd.f32 %v224_v29, %v223_v28  ;;  %v228_v32 = vsel %vm222_vm0, %v221_v27, 0.0 }
  0xcd   : > { %v227_v33 = vadd.f32 %v226_v31, %v225_v30 }
  0xcf   : > { %v229_v34 = vadd.f32 %v228_v32, %v227_v33 }
  0xd1   : > { %v230_v35 = vrot.slane %v229_v34, 4 }
  0xd3   : > { %v231_v36 = vadd.f32 %v230_v35, %v229_v34 }
  0xd5   : > { %v232_v37 = vrot.slane %v231_v36, 2 }
  0xd7   : > { %v233_v38 = vadd.f32 %v232_v37, %v231_v36 }
  0xd9   : > { %v234_v39 = vrot.slane %v233_v38, 1 }
  0xdb   : > { %v235_v40 = vadd.f32 %v234_v39, %v233_v38 }
  0xdd   : > { %v236_v43 = vmax.f32 %v235_v40, 0.0 }
  0xdf   : > { %v242_v46 = vmul.f32 %v238_v41, %v236_v43  ;;  %v241_v47 = vmul.f32 %v237_v42, %v236_v43  ;;  %v244_v50 = vmul.f32 %v240_v44, %v236_v43  ;;  %v243_v51 = vmul.f32 %v239_v45, %v236_v43 }
  0xe1   : > { %v248_v48 = vsel %vm222_vm0, %v242_v46, 0.0  ;;  %v245_v49 = vsel %vm222_vm0, %v241_v47, 0.0  ;;  %v254_v52 = vsel %vm222_vm0, %v244_v50, 0.0  ;;  %v251_v53 = vsel %vm222_vm0, %v243_v51, 0.0 }
  0xe2   : > { %249 = vadd.xlane.f32.xlu1 %v248_v48  ;;  %246 = vadd.xlane.f32.xlu0 %v245_v49 }
  0xe6   : > { %255 = vadd.xlane.f32.xlu1 %v254_v52  ;;  %252 = vadd.xlane.f32.xlu0 %v251_v53 }
 0x16b   : > { %v250_v54 = vpop.xlane.xlu1 %249  ;;  %v247_v55 = vpop.xlane.xlu0 %246 }
 0x16c   : > { %v394_v56 = vmul.f32 -1.442695, %v250_v54  ;;  %v393_v57 = vmul.f32 -1.442695, %v247_v55 }
 0x16e   : > { %454 = vpow2.f32 %v394_v56 }
 0x16f   : > { %456 = vpow2.f32 %v393_v57  ;;  %v256_v58 = vpop.xlane.xlu1 %255  ;;  %v253_v59 = vpop.xlane.xlu0 %252 }
 0x170   : > { %v396_v60 = vmul.f32 -1.442695, %v256_v58  ;;  %v395_v61 = vmul.f32 -1.442695, %v253_v59 }
 0x172   : > { %458 = vpow2.f32 %v396_v60 }
 0x173   : > { %460 = vpow2.f32 %v395_v61 }
 0x17b   : > { %v455_v62 = vpop.eup %454 }
 0x17c   : > { %v457_v63 = vpop.eup %456  ;;  %v270_v3 = vadd.f32 1.0, %v455_v62 }
 0x17d   : > { %v269_v7 = vadd.f32 1.0, %v457_v63 }
 0x17e   : > { %462 = vrcp.f32 %v270_v3 }
 0x17f   : > { %v459_v10 = vpop.eup %458  ;;  %464 = vrcp.f32 %v269_v7 }
 0x180   : > { %v461_v11 = vpop.eup %460  ;;  %v272_v12 = vadd.f32 1.0, %v459_v10 }
 0x181   : > { %v271_v13 = vadd.f32 1.0, %v461_v11 }
 0x182   : > { %466 = vrcp.f32 %v272_v12 }
 0x183   : > { %468 = vrcp.f32 %v271_v13 }
 0x18b   : > { %v463_v14 = vpop.eup %462 }
 0x18c   : > { %v465_v15 = vpop.eup %464  ;;  %v283_v16 = vmul.f32 %v463_v14, %v707_v5  ;;  %v284_v17 = vmul.f32 %v463_v14, %v709_v6 }
 0x18d   : > { %v281_v18 = vmul.f32 %v465_v15, %v697_v0  ;;  %v282_v19 = vmul.f32 %v465_v15, %v699_v1 }
 0x18e   : > { %291 = vst [vmem:[%s188_s4 + $0x10] sm:$0xff] %v283_v16  ;;  %292 = vst [vmem:[%s188_s4 + $0x18] sm:$0xff] %v284_v17 }
 0x18f   : > { %v467_v20 = vpop.eup %466  ;;  %289 = vst [vmem:[%s188_s4] sm:$0xff] %v281_v18  ;;  %290 = vst [vmem:[%s188_s4 + $0x8] sm:$0xff] %v282_v19 }
 0x190   : > { %v469_v21 = vpop.eup %468  ;;  %v287_v5 = vmul.f32 %v467_v20, %v713_v8  ;;  %v288_v6 = vmul.f32 %v467_v20, %v715_v9 }
 0x191   : > { %v285_v0 = vmul.f32 %v469_v21, %v701_v2  ;;  %v286_v1 = vmul.f32 %v469_v21, %v705_v4 }
 0x192   : > { %295 = vst [vmem:[%s188_s4 + $0x30] sm:$0xff] %v287_v5  ;;  %296 = vst [vmem:[%s188_s4 + $0x38] sm:$0xff] %v288_v6 }
 0x193   : > { %293 = vst [vmem:[%s188_s4 + $0x20] sm:$0xff] %v285_v0  ;;  %294 = vst [vmem:[%s188_s4 + $0x28] sm:$0xff] %v286_v1 }
 0x194   : > { %511 = shalt.err (!%p508_p10)
}
 0x195   : > { %s512_s26 = scalar_lea.hbm %s765_s17, 1024  ;;  %s516_s29 = scalar_lea.hbm %s815_s3, 2048 }
 0x196   : > { %p513_p0 = scmp.ne.s32.totalorder %s765_s17, %s512_s26  ;;  %p517_p1 = scmp.lt.s32.totalorder %s765_s17, %s815_s3 }
 0x197   : > { %p518_p3 = scmp.lt.s32.totalorder %s516_s29, %s512_s26 }
 0x198   : > { %p514_p2 = pnand %p513_p0, %p824_p12 }
 0x199   : > { %p519_p6 = por %p518_p3, %p517_p1 }
 0x19a   : > { %p515_p9 = pneg %p514_p2 }
 0x19c   : > { %p520_p11 = pnand %p519_p6, %p515_p9 }
 0x19e   : > { %523 = shalt.err (!%p520_p11)
}
 0x19f   : > { %s568_s11 = smov 256   ;;  %s569_s23 = smov 16  }
 0x1a0   : > { %406 = dma.vmem_to_hbm [thread:$0]  (%p824_p12), %s767_s6, 1024, %s765_s17, %s298_s16, %s568_s11, %s568_s11, %s569_s23  }
 0x1a1 PF: > { %s326_s4 = sand.u32 1, %s550_s12   ;;  %p825_p13 = scmp.ne.s32.totalorder %s821_s25, 0 }
 0x1a2   : > { %p826_p4 = scmp.ge.s32.totalorder %s562_s15, 2  ;;  %s327_s7 = scalar_lea.sflag [#allocation4], %s326_s4 }
 0x1a4   : > { %p413_p5 = pnand %p826_p4, %p825_p13 }
 0x1a6   : > { %p414_p7 = pneg %p413_p5 }
 0x1a8   : > { %545 = dma.done.wait (%p414_p7), %s327_s7, 1024  }
 0x1a9   : > { %547 = vsyncadd (%p414_p7), %s327_s7, 4294966272  ;;  %p16_p8 = scmp.ge.s32.totalorder %s615_s18, 4   ;;  %s827_s12 = smov %s554_s13 }
 0x1aa   : > { %s828_s13 = smov %s558_s14  ;;  %s829_s14 = smov %s627_s21 }
 0x1ab   : > { %s830_s15 = smov %s615_s18  ;;  %18 = sbr.rel (!%p16_p8) target bundleno = 5 (0x5), region = 77 }
 0x1b0   :  { %332 = vsyncpa [#allocation3], 1 }
 0x1b1   :  { %334 = vsyncpa [#allocation3 + $0x1], 1 }
 0x1b2   :  { %335 = vsyncpa [#allocation4], 1 }
 0x1b3   :  { %337 = vsyncpa [#allocation4 + $0x1], 1 }

</bundles_post_ra>
